<compile_context>
chip_gen: v5e
topology: v5e:2x2
jax: 0.10.0
libtpu: 0.0.40
codegen_flags: <defaults>
</compile_context>

<pallas_src>
import functools

import jax
import jax.numpy as jnp
from jax.experimental import pallas as pl
from jax.experimental.pallas import tpu as pltpu


def _r2h_kernel(x_ref, wp_ref, bp_ref, wq_ref, bq_ref, o_ref, *,
                proj_act, proj_norm, quarter):
    # x_ref : (bm, input_dim)         input rows
    # wp_ref: (input_dim, proj_dim)   projection weight (already transposed: x @ wp)
    # bp_ref: (1, proj_dim)
    # wq_ref: (proj_dim, input_dim)   assembled quaternion Hamilton-product weight
    # bq_ref: (1, input_dim)
    # o_ref : (bm, input_dim)
    h = jnp.dot(x_ref[...], wp_ref[...], preferred_element_type=jnp.float32)
    h = h + bp_ref[...]

    if proj_act == 'tanh':
        h = jnp.tanh(h)
    elif proj_act == 'hardtanh':
        h = jnp.clip(h, -1.0, 1.0)
    else:  # module default: ReLU
        h = jnp.maximum(h, 0.0)

    if proj_norm:
        q = quarter
        r = h[:, 0 * q:1 * q]
        i = h[:, 1 * q:2 * q]
        j = h[:, 2 * q:3 * q]
        k = h[:, 3 * q:4 * q]
        inv = 1.0 / jnp.sqrt(r * r + i * i + j * j + k * k + 1e-4)
        h = h * jnp.concatenate([inv, inv, inv, inv], axis=1)

    y = jnp.dot(h, wq_ref[...], preferred_element_type=jnp.float32)
    y = y + bq_ref[...]
    o_ref[...] = jnp.tanh(y).astype(o_ref.dtype)


def assemble_quaternion_weight(r_w, i_w, j_w, k_w):
    """Mirrors quaternion_linear()'s torch.cat construction.

    r/i/j/k: (proj_dim//4, input_dim//4)  ->  (proj_dim, input_dim)
    """
    col_r = jnp.concatenate([r_w, -i_w, -j_w, -k_w], axis=0)
    col_i = jnp.concatenate([i_w, r_w, -k_w, j_w], axis=0)
    col_j = jnp.concatenate([j_w, k_w, r_w, -i_w], axis=0)
    col_k = jnp.concatenate([k_w, -j_w, i_w, r_w], axis=0)
    return jnp.concatenate([col_r, col_i, col_j, col_k], axis=1)


def r2h_forward(x, w_proj, b_proj, w_quat, b_quat, *,
                proj_act='relu', proj_norm=True):
    """Fused R2H forward (trained=False path).

    x      : (..., input_dim)
    w_proj : (input_dim, proj_dim)   (transpose of torch nn.Linear weight)
    b_proj : (proj_dim,)
    w_quat : (proj_dim, input_dim)   assembled via assemble_quaternion_weight()
    b_quat : (input_dim,)
    """
    orig_shape = x.shape
    input_dim = orig_shape[-1]
    proj_dim = w_proj.shape[1]
    assert proj_dim % 4 == 0, "quaternion hidden size must be divisible by 4"
    assert w_quat.shape == (proj_dim, input_dim)

    x2 = x.reshape(-1, input_dim).astype(jnp.float32)
    B = x2.shape[0]

    # Batch row-tiling: keep whole batch in one block when small; 128-row tiles
    # (parallel grid steps -> megacore/v7x dual-TC) when it is large & divisible.
    if B % 8 == 0 and B % min(B, 128) == 0:
        block_rows = min(B, 128)
    else:
        block_rows = B
    grid = (B // block_rows,)

    kernel = functools.partial(_r2h_kernel,
                               proj_act=proj_act,
                               proj_norm=bool(proj_norm),
                               quarter=proj_dim // 4)

    out = pl.pallas_call(
        kernel,
        out_shape=jax.ShapeDtypeStruct((B, input_dim), jnp.float32),
        grid_spec=pltpu.PrefetchScalarGridSpec(
            num_scalar_prefetch=0,
            grid=grid,
            in_specs=[
                pl.BlockSpec((block_rows, input_dim), lambda m: (m, 0)),
                pl.BlockSpec((input_dim, proj_dim), lambda m: (0, 0)),
                pl.BlockSpec((1, proj_dim), lambda m: (0, 0)),
                pl.BlockSpec((proj_dim, input_dim), lambda m: (0, 0)),
                pl.BlockSpec((1, input_dim), lambda m: (0, 0)),
            ],
            out_specs=pl.BlockSpec((block_rows, input_dim), lambda m: (m, 0)),
        ),
        compiler_params=pltpu.CompilerParams(
            dimension_semantics=("parallel",)),
    )(x2,
      w_proj.astype(jnp.float32),
      b_proj.reshape(1, proj_dim).astype(jnp.float32),
      w_quat.astype(jnp.float32),
      b_quat.reshape(1, input_dim).astype(jnp.float32))

    return out.reshape(orig_shape[:-1] + (input_dim,))


def _reference(x, w_proj, b_proj, r_w, i_w, j_w, k_w, b_quat, *,
               proj_act='relu', proj_norm=True):
    """Pure-JAX reference mirroring the PyTorch forward."""
    h = x @ w_proj + b_proj[None, :]
    if proj_act == 'tanh':
        h = jnp.tanh(h)
    elif proj_act == 'hardtanh':
        h = jnp.clip(h, -1.0, 1.0)
    else:
        h = jnp.maximum(h, 0.0)
    if proj_norm:
        q = h.shape[-1] // 4
        r = h[:, 0 * q:1 * q]
        i = h[:, 1 * q:2 * q]
        j = h[:, 2 * q:3 * q]
        k = h[:, 3 * q:4 * q]
        norm = jnp.sqrt(r * r + i * i + j * j + k * k + 1e-4)
        h = jnp.concatenate([r / norm, i / norm, j / norm, k / norm], axis=1)
    wq = assemble_quaternion_weight(r_w, i_w, j_w, k_w)
    y = h @ wq + b_quat[None, :]
    return jnp.tanh(y)


if __name__ == "__main__":
    # R2H(proj_dim=128, proj_act='relu', proj_norm=True, input_dim=128); batch=16.
    # Shapes chosen so the kernel is lane/sublane dense (128 lanes, 16 sublane rows).
    B, input_dim, proj_dim = 16, 128, 128
    in_q, out_q = proj_dim // 4, input_dim // 4

    key = jax.random.PRNGKey(0)
    kx, kwp, kbp, kr, ki, kj, kk = jax.random.split(key, 7)

    x = jax.random.normal(kx, (B, input_dim), dtype=jnp.float32)

    # Deterministic synthetic init (the module's quaternion_init uses scipy/NumPy RNG
    # on the host and is stochastic anyway); shapes match the Parameters.
    w_proj = jax.random.normal(kwp, (input_dim, proj_dim), jnp.float32) / jnp.sqrt(input_dim)
    b_proj = 0.1 * jax.random.normal(kbp, (proj_dim,), jnp.float32)

    qscale = 1.0 / jnp.sqrt(2.0 * (in_q + out_q))
    r_w = qscale * jax.random.normal(kr, (in_q, out_q), jnp.float32)
    i_w = qscale * jax.random.normal(ki, (in_q, out_q), jnp.float32)
    j_w = qscale * jax.random.normal(kj, (in_q, out_q), jnp.float32)
    k_w = qscale * jax.random.normal(kk, (in_q, out_q), jnp.float32)
    b_quat = jnp.zeros((input_dim,), jnp.float32)  # reset_parameters() zeroes the bias

    # Hamilton-product weight assembled ONCE outside the kernel (hoisted per review).
    w_quat = assemble_quaternion_weight(r_w, i_w, j_w, k_w)

    out = r2h_forward(x, w_proj, b_proj, w_quat, b_quat,
                      proj_act='relu', proj_norm=True)
    out = jax.block_until_ready(out)

    ref = _reference(x, w_proj, b_proj, r_w, i_w, j_w, k_w, b_quat,
                     proj_act='relu', proj_norm=True)
    assert out.shape == (B, input_dim), out.shape
    err = float(jnp.max(jnp.abs(out - ref)))
    assert err < 1e-4, err

    # TODO(synk): the `trained=True` early-return branch (returns the normalized
    # projection without the quaternion layer / tanh) is not exposed as a separate
    # kernel; only the default inference path is implemented.

    print("KERNEL_OK")
</pallas_src>

<mosaic_0001>
module attributes {stable_mosaic.version = 11 : i64} {
  func.func @_r2h_kernel(%arg0: i32, %arg1: memref<16x128xf32, #tpu.memory_space<vmem>>, %arg2: memref<128x128xf32, #tpu.memory_space<vmem>>, %arg3: memref<1x128xf32, #tpu.memory_space<vmem>>, %arg4: memref<128x128xf32, #tpu.memory_space<vmem>>, %arg5: memref<1x128xf32, #tpu.memory_space<vmem>>, %arg6: memref<16x128xf32, #tpu.memory_space<vmem>>) attributes {dimension_semantics = [#tpu.dimension_semantics<parallel>], iteration_bounds = array<i64: 1>, scalar_prefetch = 0 : i64, scratch_operands = 0 : i64, tpu.core_type = #tpu.core_type<tc>, window_params = [{transform_indices = @transform_0, window_bounds = array<i64: 16, 128>}, {pipeline_mode = #tpu.pipeline_mode<synchronous>, transform_indices = @transform_1, window_bounds = array<i64: 128, 128>}, {pipeline_mode = #tpu.pipeline_mode<synchronous>, transform_indices = @transform_2, window_bounds = array<i64: 1, 128>}, {pipeline_mode = #tpu.pipeline_mode<synchronous>, transform_indices = @transform_3, window_bounds = array<i64: 128, 128>}, {pipeline_mode = #tpu.pipeline_mode<synchronous>, transform_indices = @transform_4, window_bounds = array<i64: 1, 128>}, {transform_indices = @transform_5, window_bounds = array<i64: 16, 128>}]} {
    %c0 = arith.constant 0 : index
    %c0_0 = arith.constant 0 : index
    %0 = vector.load %arg1[%c0, %c0_0] : memref<16x128xf32, #tpu.memory_space<vmem>>, vector<16x128xf32>
    %c0_1 = arith.constant 0 : index
    %c0_2 = arith.constant 0 : index
    %1 = vector.load %arg2[%c0_1, %c0_2] : memref<128x128xf32, #tpu.memory_space<vmem>>, vector<128x128xf32>
    %cst = arith.constant dense<0.000000e+00> : vector<16x128xf32>
    %2 = tpu.matmul %0, %1, %cst {dimension_numbers = #tpu.dot_dimension_numbers<[1], [0], [0], [1], [0, 0, 1, 1], [], []>} : vector<16x128xf32>, vector<128x128xf32>, vector<16x128xf32> -> vector<16x128xf32>
    %c0_3 = arith.constant 0 : index
    %c0_4 = arith.constant 0 : index
    %3 = vector.load %arg3[%c0_3, %c0_4] : memref<1x128xf32, #tpu.memory_space<vmem>>, vector<1x128xf32>
    %4 = vector.broadcast %3 : vector<1x128xf32> to vector<16x128xf32>
    %5 = arith.addf %2, %4 : vector<16x128xf32>
    %cst_5 = arith.constant 0.000000e+00 : f32
    %6 = vector.broadcast %cst_5 : f32 to vector<16x128xf32>
    %7 = arith.maximumf %5, %6 : vector<16x128xf32>
    %8 = vector.extract_strided_slice %7 {offsets = [0, 0], sizes = [16, 32], strides = [1, 1]} : vector<16x128xf32> to vector<16x32xf32>
    %9 = vector.extract_strided_slice %7 {offsets = [0, 32], sizes = [16, 32], strides = [1, 1]} : vector<16x128xf32> to vector<16x32xf32>
    %10 = vector.extract_strided_slice %7 {offsets = [0, 64], sizes = [16, 32], strides = [1, 1]} : vector<16x128xf32> to vector<16x32xf32>
    %11 = vector.extract_strided_slice %7 {offsets = [0, 96], sizes = [16, 32], strides = [1, 1]} : vector<16x128xf32> to vector<16x32xf32>
    %12 = arith.mulf %8, %8 : vector<16x32xf32>
    %13 = arith.mulf %9, %9 : vector<16x32xf32>
    %14 = arith.addf %12, %13 : vector<16x32xf32>
    %15 = arith.mulf %10, %10 : vector<16x32xf32>
    %16 = arith.addf %14, %15 : vector<16x32xf32>
    %17 = arith.mulf %11, %11 : vector<16x32xf32>
    %18 = arith.addf %16, %17 : vector<16x32xf32>
    %cst_6 = arith.constant 9.99999974E-5 : f32
    %19 = vector.broadcast %cst_6 : f32 to vector<16x32xf32>
    %20 = arith.addf %18, %19 : vector<16x32xf32>
    %21 = math.sqrt %20 : vector<16x32xf32>
    %cst_7 = arith.constant 1.000000e+00 : f32
    %22 = vector.broadcast %cst_7 : f32 to vector<16x32xf32>
    %23 = arith.divf %22, %21 : vector<16x32xf32>
    %24 = tpu.concatenate %23, %23, %23, %23 in 1 : vector<16x32xf32>, vector<16x32xf32>, vector<16x32xf32>, vector<16x32xf32> -> vector<16x128xf32>
    %25 = arith.mulf %7, %24 : vector<16x128xf32>
    %c0_8 = arith.constant 0 : index
    %c0_9 = arith.constant 0 : index
    %26 = vector.load %arg4[%c0_8, %c0_9] : memref<128x128xf32, #tpu.memory_space<vmem>>, vector<128x128xf32>
    %cst_10 = arith.constant dense<0.000000e+00> : vector<16x128xf32>
    %27 = tpu.matmul %25, %26, %cst_10 {dimension_numbers = #tpu.dot_dimension_numbers<[1], [0], [0], [1], [0, 0, 1, 1], [], []>} : vector<16x128xf32>, vector<128x128xf32>, vector<16x128xf32> -> vector<16x128xf32>
    %c0_11 = arith.constant 0 : index
    %c0_12 = arith.constant 0 : index
    %28 = vector.load %arg5[%c0_11, %c0_12] : memref<1x128xf32, #tpu.memory_space<vmem>>, vector<1x128xf32>
    %29 = vector.broadcast %28 : vector<1x128xf32> to vector<16x128xf32>
    %30 = arith.addf %27, %29 : vector<16x128xf32>
    %31 = math.tanh %30 : vector<16x128xf32>
    %c0_13 = arith.constant 0 : index
    %c0_14 = arith.constant 0 : index
    %32 = vector.load %arg6[%c0_13, %c0_14] : memref<16x128xf32, #tpu.memory_space<vmem>>, vector<16x128xf32>
    tpu.vector_store %arg6[%c0_13, %c0_14], %31 {strides = array<i32>} : memref<16x128xf32, #tpu.memory_space<vmem>>, vector<16x128xf32>,
    return
  }
  func.func @transform_0(%arg0: i32) -> (i32, i32) {
    %c0_i32 = arith.constant 0 : i32
    %c0_i32_0 = arith.constant 0 : i32
    return %arg0, %c0_i32 : i32, i32
  }
  func.func @transform_1(%arg0: i32) -> (i32, i32) {
    %c0_i32 = arith.constant 0 : i32
    %c0_i32_0 = arith.constant 0 : i32
    %c0_i32_1 = arith.constant 0 : i32
    return %c0_i32, %c0_i32_0 : i32, i32
  }
  func.func @transform_2(%arg0: i32) -> (i32, i32) {
    %c0_i32 = arith.constant 0 : i32
    %c0_i32_0 = arith.constant 0 : i32
    %c0_i32_1 = arith.constant 0 : i32
    return %c0_i32, %c0_i32_0 : i32, i32
  }
  func.func @transform_3(%arg0: i32) -> (i32, i32) {
    %c0_i32 = arith.constant 0 : i32
    %c0_i32_0 = arith.constant 0 : i32
    %c0_i32_1 = arith.constant 0 : i32
    return %c0_i32, %c0_i32_0 : i32, i32
  }
  func.func @transform_4(%arg0: i32) -> (i32, i32) {
    %c0_i32 = arith.constant 0 : i32
    %c0_i32_0 = arith.constant 0 : i32
    %c0_i32_1 = arith.constant 0 : i32
    return %c0_i32, %c0_i32_0 : i32, i32
  }
  func.func @transform_5(%arg0: i32) -> (i32, i32) {
    %c0_i32 = arith.constant 0 : i32
    %c0_i32_0 = arith.constant 0 : i32
    return %arg0, %c0_i32 : i32, i32
  }
}

</mosaic_0001>

<bundles_post_ra>
// kernel: tpu_custom_call.1
= control target key start
LH: loop header
LB: loop body
LE: loop exit
PB: predicated region body
PF: predicated region fallthrough
CT: control target
= control target key end

     0   :  { %10 = vsyncpa [#allocation3], 0  ;;  %s551_s0 = inlined_call_operand.hbm [shape: f32[16,128], index: 0, kind: input, shape index: {}]   ;;  %s552_s1 = inlined_call_operand.hbm [shape: f32[128,128], index: 1, kind: input, shape index: {}]   ;;  %s553_s2 = inlined_call_operand.vmem [shape: f32[1,128], index: 2, kind: input, shape index: {}]   ;;  %s554_s3 = inlined_call_operand.hbm [shape: f32[128,128], index: 3, kind: input, shape index: {}]   ;;  %s555_s4 = inlined_call_operand.vmem [shape: f32[1,128], index: 4, kind: input, shape index: {}]   ;;  %s556_s5 = inlined_call_operand.hbm [shape: f32[16,128], index: 5, kind: output, shape index: {}]  }
   0x1   :  { %11 = vsyncpa [#allocation6], 0 }
   0x2   :  { %12 = vsyncpa [#allocation4], 0  ;;  %s30_s20 = sshll.u32 %s552_s1, 4  ;;  %s454_s21 = smov [#allocation5]   ;;  %s31_s20 = int_to_ptr.hbm [resolvable:$true] %s30_s20 }
   0x3   :  { %s32_s22 = sshll.u32 %s454_s21, 4  ;;  %s17_s25 = sshll.u32 %s551_s0, 4  ;;  %s33_s22 = int_to_ptr.vmem [resolvable:$true] %s32_s22  ;;  %s18_s25 = int_to_ptr.hbm [resolvable:$true] %s17_s25 }
   0x4   :  { %s455_s26 = smov 128   ;;  %s456_s27 = smov 8  }
   0x5   :  { %38 = dma.hbm_to_vmem [thread:$0]  %s31_s20, 2048, %s33_s22, [#allocation6], %s455_s26, %s455_s26, %s456_s27  }
   0x6   :  { %s457_s28 = smov [#allocation2]   ;;  %s45_s1 = sshll.u32 %s554_s3, 4  ;;  %s46_s1 = int_to_ptr.hbm [resolvable:$true] %s45_s1 }
   0x7   :  { %s19_s29 = sshll.u32 %s457_s28, 4  ;;  %s458_s0 = smov [#allocation7]   ;;  %s20_s29 = int_to_ptr.vmem [resolvable:$true] %s19_s29 }
   0x8   :  { %25 = dma.hbm_to_vmem [thread:$0]  %s18_s25, 256, %s20_s29, [#allocation3], %s455_s26, %s455_s26, %s456_s27  }
   0x9   :  { %s47_s7 = sshll.u32 %s458_s0, 4  ;;  %s48_s7 = int_to_ptr.vmem [resolvable:$true] %s47_s7 }
   0xa   :  { %53 = dma.hbm_to_vmem [thread:$0]  %s46_s1, 2048, %s48_s7, [#allocation6], %s455_s26, %s455_s26, %s456_s27  }
   0xb   :  { %448 = dma.done.wait [#allocation3], 256  }
   0xc   :  { %449 = vsyncadd [#allocation3], 4294967040 }
   0xd   :  { %450 = dma.done.wait [#allocation6], 4096  }
   0xe   :  { %451 = vsyncadd [#allocation6], 4294963200  ;;  %v85_v0 = vld [vmem:[#allocation5 + $0x78] sm:$0xff]  ;;  %v84_v1 = vld [vmem:[#allocation5 + $0x70] sm:$0xff]  ;;  %s459_s9 = smov 64   ;;  %s460_s10 = smov 32  }
   0xf   :  { %297 = vmatpush.msra.mxu2 %v85_v0  ;;  %90 = vmatpush.msra.mxu0 %v85_v0  ;;  %v83_v2 = vld [vmem:[#allocation5 + $0x68] sm:$0xff]  ;;  %v82_v3 = vld [vmem:[#allocation5 + $0x60] sm:$0xff]  ;;  %v81_v4 = vld [vmem:[#allocation5 + $0x58] sm:$0xff]  ;;  %vm219_vm12 = vcmask 261120   ;;  %vm222_vm13 = vcmask 523264   ;;  %vm225_vm14 = vcmask 785408  }
  0x10   :  { %v80_v5 = vld [vmem:[#allocation5 + $0x50] sm:$0xff]  ;;  %v79_v6 = vld [vmem:[#allocation5 + $0x48] sm:$0xff]  ;;  %v78_v7 = vld [vmem:[#allocation5 + $0x40] sm:$0xff]  ;;  %s462_s13 = smov [#allocation8]   ;;  %s283_s17 = sshll.u32 %s556_s5, 4  ;;  %s284_s17 = int_to_ptr.hbm [resolvable:$true] %s283_s17 }
  0x11   :  { %298 = vmatpush.msra.mxu2 %v84_v1  ;;  %91 = vmatpush.msra.mxu0 %v84_v1  ;;  %v77_v8 = vld [vmem:[#allocation5 + $0x38] sm:$0xff]  ;;  %v76_v9 = vld [vmem:[#allocation5 + $0x30] sm:$0xff]  ;;  %v75_v10 = vld [vmem:[#allocation5 + $0x28] sm:$0xff]  ;;  %s281_s14 = sshll.u32 %s462_s13, 4  ;;  %s282_s14 = int_to_ptr.vmem [resolvable:$true] %s281_s14 }
  0x12   :  { %v74_v11 = vld [vmem:[#allocation5 + $0x20] sm:$0xff]  ;;  %v73_v12 = vld [vmem:[#allocation5 + $0x18] sm:$0xff]  ;;  %v72_v13 = vld [vmem:[#allocation5 + $0x10] sm:$0xff] }
  0x13   :  { %299 = vmatpush.msra.mxu2 %v83_v2  ;;  %92 = vmatpush.msra.mxu0 %v83_v2  ;;  %v71_v14 = vld [vmem:[#allocation5 + $0x8] sm:$0xff]  ;;  %v70_v15 = vld [vmem:[#allocation5] sm:$0xff]  ;;  %v69_v16 = vld [vmem:[#allocation2 + $0x8] sm:$0xff] }
  0x14   :  { %v68_v17 = vld [vmem:[#allocation2] sm:$0xff]  ;;  %v245_v52 = vld [vmem:[#allocation7 + $0x78] sm:$0xff] }
  0x15   :  { %300 = vmatpush.msra.mxu2 %v82_v3  ;;  %93 = vmatpush.msra.mxu0 %v82_v3  ;;  %v338_v18 = vld [vmem:[%s553_s2] ss:$0 sm:$0xff]  ;;  %s461_s2 = smov 96  }
  0x16   :  { %313 = vmatpush.msra.mxu3 %v245_v52  ;;  %250 = vmatpush.msra.mxu1 %v245_v52 }
  0x17   :  { %301 = vmatpush.msra.mxu2 %v81_v4  ;;  %94 = vmatpush.msra.mxu0 %v81_v4 }
  0x19   :  { %302 = vmatpush.msra.mxu2 %v80_v5  ;;  %95 = vmatpush.msra.mxu0 %v80_v5 }
  0x1b   :  { %303 = vmatpush.msra.mxu2 %v79_v6  ;;  %96 = vmatpush.msra.mxu0 %v79_v6 }
  0x1d   :  { %304 = vmatpush.msra.mxu2 %v78_v7  ;;  %97 = vmatpush.msra.mxu0 %v78_v7 }
  0x1f   :  { %305 = vmatpush.msra.mxu2 %v77_v8  ;;  %98 = vmatpush.msra.mxu0 %v77_v8 }
  0x21   :  { %306 = vmatpush.msra.mxu2 %v76_v9  ;;  %99 = vmatpush.msra.mxu0 %v76_v9 }
  0x23   :  { %307 = vmatpush.msra.mxu2 %v75_v10  ;;  %100 = vmatpush.msra.mxu0 %v75_v10 }
  0x25   :  { %308 = vmatpush.msra.mxu2 %v74_v11  ;;  %101 = vmatpush.msra.mxu0 %v74_v11 }
  0x27   :  { %309 = vmatpush.msra.mxu2 %v73_v12  ;;  %102 = vmatpush.msra.mxu0 %v73_v12 }
  0x29   :  { %310 = vmatpush.msra.mxu2 %v72_v13  ;;  %103 = vmatpush.msra.mxu0 %v72_v13 }
  0x2b   :  { %311 = vmatpush.msra.mxu2 %v71_v14  ;;  %104 = vmatpush.msra.mxu0 %v71_v14 }
  0x2d   :  { %312 = vmatpush.msra.mxu2 %v70_v15  ;;  %105 = vmatpush.msra.mxu0 %v70_v15 }
  0x2e   :  { %109 = vmatmul.f32.vlgmr.msra.gmra.mxu2 %v69_v16  ;;  %106 = vmatmul.f32.vlgmr.msra.gmra.mxu0 %v68_v17 }
  0xab   :  { %v107_v19 = vpop.f32.mrf.mxu0 }
  0xac   :  { %v108_v20 = vadd.f32 %v338_v18, %v107_v19  ;;  %v243_v19 = vld [vmem:[#allocation7 + $0x68] sm:$0xff] }
  0xae   :  { %v514_v21 = vmax.f32 %v108_v20, 0.0  ;;  %v242_v20 = vld [vmem:[#allocation7 + $0x60] sm:$0xff] }
  0xb0   :  { %v115_v22 = vmul.f32 %v514_v21, %v514_v21 }
  0xb1   :  { %v110_v23 = vpop.f32.mrf.mxu2 }
  0xb2   :  { %v111_v24 = vadd.f32 %v338_v18, %v110_v23  ;;  %127 = vrot.lane.b32.xlu2 %v115_v22, %s459_s9  ;;  %v244_v18 = vld [vmem:[#allocation7 + $0x70] sm:$0xff] }
  0xb3   :  { %314 = vmatpush.msra.mxu3 %v244_v18  ;;  %251 = vmatpush.msra.mxu1 %v244_v18  ;;  %v240_v23 = vld [vmem:[#allocation7 + $0x50] sm:$0xff] }
  0xb4   :  { %v519_v25 = vmax.f32 %v111_v24, 0.0  ;;  %v239_v24 = vld [vmem:[#allocation7 + $0x48] sm:$0xff] }
  0xb5   :  { %315 = vmatpush.msra.mxu3 %v243_v19  ;;  %252 = vmatpush.msra.mxu1 %v243_v19 }
  0xb6   :  { %v116_v26 = vmul.f32 %v519_v25, %v519_v25 }
  0xb7   :  { %316 = vmatpush.msra.mxu3 %v242_v20  ;;  %253 = vmatpush.msra.mxu1 %v242_v20 }
  0xb8   :  { %137 = vrot.lane.b32.xlu1 %v116_v26, %s460_s10  ;;  %121 = vrot.lane.b32.xlu0 %v116_v26, %s461_s2 }
  0xba   :  { %135 = vrot.lane.b32.xlu2 %v115_v22, %s460_s10 }
  0xc0   :  { %129 = vrot.lane.b32.xlu0 %v116_v26, %s459_s9  ;;  %119 = vrot.lane.b32.xlu1 %v115_v22, %s461_s2 }
 0x10c   :  { %v128_v29 = vpop.permute.xlu2 %127 }
 0x114   :  { %v136_v37 = vpop.permute.xlu2 %135 }
 0x12a   :  { %v138_v27 = vpop.permute.xlu1 %137  ;;  %v122_v28 = vpop.permute.xlu0 %121 }
 0x12b   :  { %v126_v30 = vadd.f32 %v122_v28, %v116_v26  ;;  %v238_v26 = vld [vmem:[#allocation7 + $0x40] sm:$0xff]  ;;  %v236_v28 = vld [vmem:[#allocation7 + $0x30] sm:$0xff] }
 0x132   :  { %v130_v31 = vpop.permute.xlu0 %129  ;;  %v120_v32 = vpop.permute.xlu1 %119 }
 0x133   :  { %v134_v33 = vadd.f32 %v130_v31, %v126_v30  ;;  %v125_v34 = vadd.f32 %v120_v32, %v115_v22  ;;  %v241_v22 = vld [vmem:[#allocation7 + $0x58] sm:$0xff]  ;;  %v234_v30 = vld [vmem:[#allocation7 + $0x20] sm:$0xff]  ;;  %v232_v32 = vld [vmem:[#allocation7 + $0x10] sm:$0xff] }
 0x134   :  { %317 = vmatpush.msra.mxu3 %v241_v22  ;;  %254 = vmatpush.msra.mxu1 %v241_v22  ;;  %v233_v31 = vld [vmem:[#allocation7 + $0x18] sm:$0xff] }
 0x135   :  { %v142_v35 = vadd.f32 %v138_v27, %v134_v33  ;;  %v133_v36 = vadd.f32 %v128_v29, %v125_v34  ;;  %v237_v27 = vld [vmem:[#allocation7 + $0x38] sm:$0xff]  ;;  %v235_v29 = vld [vmem:[#allocation7 + $0x28] sm:$0xff]  ;;  %v230_v34 = vld [vmem:[#allocation7] sm:$0xff] }
 0x136   :  { %318 = vmatpush.msra.mxu3 %v240_v23  ;;  %255 = vmatpush.msra.mxu1 %v240_v23  ;;  %v231_v33 = vld [vmem:[#allocation7 + $0x8] sm:$0xff] }
 0x137   :  { %v144_v38 = vadd.f32 0.0001, %v142_v35  ;;  %v141_v39 = vadd.f32 %v136_v37, %v133_v36 }
 0x138   :  { %319 = vmatpush.msra.mxu3 %v239_v24  ;;  %256 = vmatpush.msra.mxu1 %v239_v24 }
 0x139   :  { %340 = vrsqrt.f32 %v144_v38  ;;  %v143_v40 = vadd.f32 0.0001, %v141_v39  ;;  %vm164_vm0 = vcmp.eq.f32.partialorder %v144_v38, inf  ;;  %v167_v55 = vand.u32 2147483648, %v144_v38 }
 0x13a   :  { %vm166_vm1 = vcmp.eq.f32.partialorder %v144_v38, 0.0  ;;  %320 = vmatpush.msra.mxu3 %v238_v26  ;;  %257 = vmatpush.msra.mxu1 %v238_v26 }
 0x13b   :  { %342 = vrsqrt.f32 %v143_v40  ;;  %vm152_vm2 = vcmp.eq.f32.partialorder %v143_v40, inf  ;;  %v155_v59 = vand.u32 2147483648, %v143_v40  ;;  %vm154_vm3 = vcmp.eq.f32.partialorder %v143_v40, 0.0 }
 0x13c   :  { %321 = vmatpush.msra.mxu3 %v237_v27  ;;  %258 = vmatpush.msra.mxu1 %v237_v27 }
 0x13e   :  { %322 = vmatpush.msra.mxu3 %v236_v28  ;;  %259 = vmatpush.msra.mxu1 %v236_v28 }
 0x13f   :  { %v341_v41 = vpop.eup %340 }
 0x140   :  { %v158_v42 = vmul.f32 %v341_v41, %v144_v38  ;;  %323 = vmatpush.msra.mxu3 %v235_v29  ;;  %260 = vmatpush.msra.mxu1 %v235_v29 }
 0x141   :  { %v343_v43 = vpop.eup %342 }
 0x142   :  { %v159_v44 = vmul.f32 %v341_v41, %v158_v42  ;;  %v146_v45 = vmul.f32 %v343_v43, %v143_v40  ;;  %324 = vmatpush.msra.mxu3 %v234_v30  ;;  %261 = vmatpush.msra.mxu1 %v234_v30 }
 0x144   :  { %v160_v46 = vmul.f32 0.5, %v159_v44  ;;  %v147_v47 = vmul.f32 %v343_v43, %v146_v45  ;;  %325 = vmatpush.msra.mxu3 %v233_v31  ;;  %262 = vmatpush.msra.mxu1 %v233_v31 }
 0x146   :  { %v161_v48 = vsub.f32 1.5, %v160_v46  ;;  %v148_v49 = vmul.f32 0.5, %v147_v47  ;;  %326 = vmatpush.msra.mxu3 %v232_v32  ;;  %263 = vmatpush.msra.mxu1 %v232_v32 }
 0x148   :  { %v162_v50 = vmul.f32 %v341_v41, %v161_v48  ;;  %v149_v51 = vsub.f32 1.5, %v148_v49  ;;  %327 = vmatpush.msra.mxu3 %v231_v33  ;;  %264 = vmatpush.msra.mxu1 %v231_v33  ;;  %v339_v49 = vld [vmem:[%s555_s4] ss:$0 sm:$0xff] }
 0x14a   :  { %v163_v53 = vmul.f32 %v162_v50, %v144_v38  ;;  %v150_v54 = vmul.f32 %v343_v43, %v149_v51  ;;  %328 = vmatpush.msra.mxu3 %v230_v34  ;;  %265 = vmatpush.msra.mxu1 %v230_v34 }
 0x14c   :  { %v165_v56 = vsel %vm164_vm0, %v144_v38, %v163_v53  ;;  %v151_v57 = vmul.f32 %v150_v54, %v143_v40 }
 0x14d   :  { %v168_v58 = vsel %vm166_vm1, %v167_v55, %v165_v56 }
 0x14e   :  { %344 = vrcp.f32 %v168_v58  ;;  %v153_v60 = vsel %vm152_vm2, %v143_v40, %v151_v57  ;;  %v195_v2 = vand.u32 2147483648, %v168_v58  ;;  %v193_v5 = vand.u32 2147483647, %v168_v58 }
 0x14f   :  { %v156_v61 = vsel %vm154_vm3, %v155_v59, %v153_v60  ;;  %vm189_vm5 = vweird.f32 %v168_v58 }
 0x150   :  { %346 = vrcp.f32 %v156_v61  ;;  %v196_v8 = vor.u32 1.1754944e-38, %v195_v2  ;;  %vm194_vm7 = vcmp.eq.f32.partialorder %v193_v5, 8.507059e+37  ;;  %v180_v13 = vand.u32 2147483648, %v156_v61 }
 0x151   :  { %vm174_vm9 = vweird.f32 %v156_v61  ;;  %v178_v14 = vand.u32 2147483647, %v156_v61 }
 0x152   :  { %v181_v16 = vor.u32 1.1754944e-38, %v180_v13 }
 0x153   :  { %vm179_vm11 = vcmp.eq.f32.partialorder %v178_v14, 8.507059e+37 }
 0x154   :  { %v345_v62 = vpop.eup %344 }
 0x155   :  { %v185_v63 = vmul.f32 %v345_v62, %v168_v58  ;;  %vm190_vm4 = vweird.f32 %v345_v62 }
 0x156   :  { %v347_v0 = vpop.eup %346  ;;  %vm191_vm6 = vmor %vm189_vm5, %vm190_vm4 }
 0x157   :  { %v186_v1 = vsub.f32 1.0, %v185_v63  ;;  %v170_v3 = vmul.f32 %v347_v0, %v156_v61  ;;  %vm175_vm8 = vweird.f32 %v347_v0 }
 0x158   :  { %vm176_vm10 = vmor %vm174_vm9, %vm175_vm8 }
 0x159   :  { %v187_v4 = vmul.f32 %v345_v62, %v186_v1  ;;  %v171_v6 = vsub.f32 1.0, %v170_v3 }
 0x15b   :  { %v188_v7 = vadd.f32 %v345_v62, %v187_v4  ;;  %v172_v9 = vmul.f32 %v347_v0, %v171_v6 }
 0x15d   :  { %v192_v10 = vsel %vm191_vm6, %v345_v62, %v188_v7  ;;  %v173_v12 = vadd.f32 %v347_v0, %v172_v9 }
 0x15e   :  { %v528_v11 = vsel %vm194_vm7, %v196_v8, %v192_v10 }
 0x15f   :  { %203 = vrot.lane.b32.xlu0 %v528_v11, %s460_s10  ;;  %215 = vrot.lane.b32.xlu2 %v528_v11, %s461_s2  ;;  %v177_v15 = vsel %vm176_vm10, %v347_v0, %v173_v12 }
 0x160   :  { %209 = vrot.lane.b32.xlu1 %v528_v11, %s459_s9  ;;  %v182_v17 = vsel %vm179_vm11, %v181_v16, %v177_v15 }
 0x167   :  { %213 = vrot.lane.b32.xlu2 %v182_v17, %s461_s2  ;;  %201 = vrot.lane.b32.xlu0 %v182_v17, %s460_s10 }
 0x168   :  { %207 = vrot.lane.b32.xlu1 %v182_v17, %s459_s9 }
 0x1b9   :  { %v216_v35 = vpop.permute.xlu2 %215 }
 0x1c1   :  { %v214_v45 = vpop.permute.xlu2 %213 }
 0x1d1   :  { %v204_v36 = vpop.permute.xlu0 %203 }
 0x1d2   :  { %v221_v37 = vsel %vm219_vm12, %v528_v11, %v204_v36  ;;  %v210_v38 = vpop.permute.xlu1 %209 }
 0x1d3   :  { %v224_v39 = vsel %vm222_vm13, %v221_v37, %v210_v38 }
 0x1d4   :  { %v227_v40 = vsel %vm225_vm14, %v224_v39, %v216_v35 }
 0x1d5   :  { %v229_v41 = vmul.f32 %v227_v40, %v519_v25 }
 0x1d7   :  { %269 = vmatmul.f32.vlgmr.msra.gmra.mxu3 %v229_v41 }
 0x1d9   :  { %v202_v42 = vpop.permute.xlu0 %201 }
 0x1da   :  { %v220_v43 = vsel %vm219_vm12, %v182_v17, %v202_v42  ;;  %v208_v44 = vpop.permute.xlu1 %207 }
 0x1db   :  { %v223_v46 = vsel %vm222_vm13, %v220_v43, %v208_v44 }
 0x1dc   :  { %v226_v47 = vsel %vm225_vm14, %v223_v46, %v214_v45 }
 0x1dd   :  { %v228_v48 = vmul.f32 %v226_v47, %v514_v21 }
 0x1df   :  { %266 = vmatmul.f32.vlgmr.msra.gmra.mxu1 %v228_v48 }
 0x25a   :  { %v270_v50 = vpop.f32.mrf.mxu3 }
 0x25b   :  { %v271_v51 = vadd.f32 %v339_v49, %v270_v50 }
 0x25c   :  { %v267_v52 = vpop.f32.mrf.mxu1 }
 0x25d   :  { %348 = vtanh.f32 %v271_v51  ;;  %v268_v53 = vadd.f32 %v339_v49, %v267_v52 }
 0x25f   :  { %350 = vtanh.f32 %v268_v53 }
 0x263   :  { %v349_v25 = vpop.eup %348 }
 0x264   :  { %276 = vst [vmem:[#allocation8 + $0x8] sm:$0xff] %v349_v25 }
 0x265   :  { %v351_v21 = vpop.eup %350 }
 0x266   :  { %275 = vst [vmem:[#allocation8] sm:$0xff] %v351_v21 }
 0x267   :  { %289 = dma.vmem_to_hbm [thread:$0]  %s282_s14, 256, %s284_s17, [#allocation4], %s455_s26, %s455_s26, %s456_s27  }
 0x268   :  { %452 = dma.done.wait [#allocation4], 256  }
 0x269   :  { %453 = vsyncadd [#allocation4], 4294967040 }
 0x26a   :  { %294 = vsyncpa [#allocation3], 1 }
 0x26b   :  { %295 = vsyncpa [#allocation6], 1 }
 0x26c   :  { %296 = vsyncpa [#allocation4], 1 }

</bundles_post_ra>
